<compile_context>
chip_gen: v5e
topology: v5e:2x2
jax: 0.10.0
libtpu: 0.0.40
codegen_flags: <defaults>
</compile_context>

<pallas_src>
import functools

import jax
import jax.numpy as jnp
from jax.experimental import pallas as pl
from jax.experimental.pallas import tpu as pltpu


def _convblock_kernel(x_ref, w_ref, shift_ref, mask_ref, sel_ref, o_ref,
                      patch_ref, *, k, img_w, hw, pool_k, imgs):
    """One packed group of `imgs` images per grid step.

    x_ref:     (imgs, Cin_p, L)     row-flattened, zero-haloed inputs (NCHW order)
    w_ref:     (Cout, K*K*Cin_p)    conv weights with BN scale folded in (f32)
    shift_ref: (Cout, 1)            folded shift = (bias - mean) * scale + beta
    mask_ref:  (K, H*W)             per-dx validity mask for the W halo
    sel_ref:   (m_total, imgs*Ho*Wo) 0/1 pooling decimation over the packed slab
    o_ref:     (1, Cout, imgs*Ho*Wo) pooled output, lane-dense
    patch_ref: (K*K*Cin_p, imgs*H*W) VMEM scratch for the packed im2col matrix
    """
    cin_p = x_ref.shape[1]
    pad = k // 2

    # im2col without relayouts: tap (dy, dx) of the conv is a contiguous lane
    # window of the flattened (H-haloed) rows; a per-dx mask zeroes the lanes
    # that wrapped across a row (they stand in for the W halo).  Each image's
    # patch segment starts at a 128-aligned lane offset (hw == 256).
    # NOTE(review audit): the source slices start at unaligned lane offsets; at
    # this size the resulting rotate copies are negligible next to DMA/step cost.
    for i in range(imgs):
        xf = x_ref[i]                                        # (Cin_p, L)
        for dy in range(k):
            for dx in range(k):
                start = (dy + 1) * img_w + dx - pad
                window = xf[:, start:start + hw]             # (Cin_p, H*W)
                if dx != pad:                                # centre tap needs no mask
                    window = window * mask_ref[dx:dx + 1, :]
                row0 = (dy * k + dx) * cin_p                 # 8-aligned rows
                patch_ref[row0:row0 + cin_p, i * hw:(i + 1) * hw] = (
                    window.astype(patch_ref.dtype))

    # Conv2d + bias + BatchNorm(eval) == one MXU matmul + a per-channel shift.
    acc = jnp.dot(w_ref[...], patch_ref[...],
                  preferred_element_type=jnp.float32)        # (Cout, imgs*H*W)
    acc = acc + shift_ref[...]                               # (Cout, 1) broadcast

    # Mish: x * tanh(softplus(x)) == x * u / (u + 2), u = e^x (e^x + 2).
    # One EUP exp + one approx reciprocal (+1 Newton step for f32 accuracy);
    # keeps PyTorch's softplus x>20 passthrough.
    t = jnp.exp(jnp.minimum(acc, 20.0))
    u = t * (t + 2.0)
    d = u + 2.0
    r = pl.reciprocal(d, approx=True)
    r = r * (2.0 - d * r)                                    # Newton polish
    y = jnp.where(acc > 20.0, acc, acc * u * r)

    # MaxPool2d(pool_k): neighbour maxima via shifted unit-stride slices (VPU),
    # then the stride-pool_k decimation as one 0/1 selection matmul (MXU) that
    # also produces the lane-dense packed output in a single aligned store.
    # Selected columns never straddle a row or an image boundary.
    m, width = y, imgs * hw
    for _ in range(pool_k - 1):                              # neighbours along W
        m = jnp.maximum(m[:, :width - 1], m[:, 1:width])
        width -= 1
    for _ in range(pool_k - 1):                              # neighbours along H
        m = jnp.maximum(m[:, :width - img_w], m[:, img_w:width])
        width -= img_w

    pooled = jnp.dot(m, sel_ref[...], preferred_element_type=jnp.float32)
    o_ref[0] = pooled.astype(o_ref.dtype)                    # (Cout, imgs*Ho*Wo)


def _pack_factor(n, howo):
    """Smallest divisor of n whose packed pooled output is lane-dense (>=128)."""
    for d in range(1, n + 1):
        if n % d == 0 and d * howo >= 128:
            return d
    return n


def conv_block_forward(x_nchw, w_oihw, b, gamma, beta, run_mean, run_var,
                       *, eps=1e-5, pool_k=2):
    """ConvBlock forward (eval): (N, Cin, H, W) -> (N, Cout, H//pool, W//pool)."""
    N, Cin, H, W = x_nchw.shape
    Cout, _, K, _ = w_oihw.shape
    assert K % 2 == 1, "even kernel sizes unsupported"  # TODO(synk): even-K padding
    pad = K // 2                                    # matches nn.Conv2d(..., padding=k//2)
    assert H % pool_k == 0 and W % pool_k == 0, (
        "MaxPool remainder not implemented")        # TODO(synk): pool remainder handling
    Ho, Wo = H // pool_k, W // pool_k
    howo = Ho * Wo
    hw = H * W
    cin_p = ((Cin + 7) // 8) * 8                    # sublane-align the channel dim
    dtype = x_nchw.dtype

    P = _pack_factor(N, howo)                       # images packed per grid step
    S = N // P                                      # grid steps

    # --- fold conv bias + BatchNorm(eval) into the weights / a single shift ---
    # (kept in f32 regardless of activation dtype, per the review's bf16 note)
    scale = gamma / jnp.sqrt(run_var + eps)                        # (Cout,)
    wt = jnp.transpose(w_oihw, (0, 2, 3, 1))                       # (Cout, K, K, Cin)
    wt = jnp.pad(wt, ((0, 0), (0, 0), (0, 0), (0, cin_p - Cin)))
    w_fold = (wt.reshape(Cout, K * K * cin_p)
              * scale[:, None]).astype(jnp.float32)
    shift = ((b - run_mean) * scale + beta).reshape(Cout, 1).astype(jnp.float32)

    # --- single-pad, row-flattened, zero-haloed input (stays NCHW order) -------
    # Pad channels to cin_p and H by (pad+1) rows each side; the extra row on
    # each side doubles as the former start/end lane halo, so ONE pad + ONE
    # reshape replaces the previous three pads (no extra XLA fusions).
    x_pad = jnp.pad(x_nchw,
                    ((0, 0), (0, cin_p - Cin), (pad + 1, pad + 1), (0, 0)))
    L = (H + 2 * pad + 2) * W
    x_flat = x_pad.reshape(N, cin_p, L)

    # --- per-dx validity masks for the W halo ----------------------------------
    w_of_col = jnp.tile(jnp.arange(W, dtype=jnp.int32), H)        # (H*W,) == col % W
    s = (jnp.arange(K, dtype=jnp.int32) - pad)[:, None]           # (K, 1)
    masks = ((w_of_col[None, :] + s >= 0)
             & (w_of_col[None, :] + s < W)).astype(jnp.float32)   # (K, H*W)

    # --- 0/1 decimation matrix for pool_k x pool_k max-pool over the packed slab
    m_total = P * hw - (pool_k - 1) * (W + 1)
    col = jnp.arange(P * howo, dtype=jnp.int32)
    col_img, col_pix = col // howo, col % howo
    src = (col_img * hw
           + pool_k * ((col_pix // Wo) * W + (col_pix % Wo)))     # (P*Ho*Wo,)
    sel = (jnp.arange(m_total, dtype=jnp.int32)[:, None]
           == src[None, :]).astype(jnp.float32)                   # (m_total, P*Ho*Wo)

    kernel = functools.partial(_convblock_kernel, k=K, img_w=W, hw=hw,
                               pool_k=pool_k, imgs=P)

    out = pl.pallas_call(
        kernel,
        out_shape=jax.ShapeDtypeStruct((S, Cout, P * howo), dtype),
        grid_spec=pltpu.PrefetchScalarGridSpec(
            num_scalar_prefetch=0,
            grid=(S,),
            in_specs=[
                pl.BlockSpec((P, cin_p, L), lambda n: (n, 0, 0)),
                pl.BlockSpec((Cout, K * K * cin_p), lambda n: (0, 0)),
                pl.BlockSpec((Cout, 1), lambda n: (0, 0)),
                pl.BlockSpec((K, hw), lambda n: (0, 0)),
                pl.BlockSpec((m_total, P * howo), lambda n: (0, 0)),
            ],
            out_specs=pl.BlockSpec((1, Cout, P * howo), lambda n: (n, 0, 0)),
            scratch_shapes=[pltpu.VMEM((K * K * cin_p, P * hw), jnp.float32)],
        ),
        compiler_params=pltpu.CompilerParams(
            dimension_semantics=("parallel",)),
    )(x_flat, w_fold, shift, masks, sel)

    # Un-pack the lane-packed images; tiny (few KiB) wrapper transpose.
    out = out.reshape(S, Cout, P, Ho, Wo).transpose(0, 2, 1, 3, 4)
    return out.reshape(N, Cout, Ho, Wo)


def _reference(x, w, b, gamma, beta, mean, var, eps=1e-5, pool_k=2):
    y = jax.lax.conv_general_dilated(
        x, w, window_strides=(1, 1), padding="SAME",
        dimension_numbers=("NCHW", "OIHW", "NCHW"))
    y = y + b[None, :, None, None]
    y = (y - mean[None, :, None, None]) / jnp.sqrt(var + eps)[None, :, None, None]
    y = y * gamma[None, :, None, None] + beta[None, :, None, None]
    sp = jnp.where(y > 20.0, y, jnp.log1p(jnp.exp(jnp.minimum(y, 20.0))))
    y = y * jnp.tanh(sp)
    N, C, H, W = y.shape
    y = y.reshape(N, C, H // pool_k, pool_k, W // pool_k, pool_k).max(axis=(3, 5))
    return y


if __name__ == "__main__":
    # ConvBlock(in_ch=4, out_ch=8, k=3, act='mish', bn=True, drop=0.1, pool_k=2)
    N, Cin, H, W = 2, 4, 16, 16
    Cout, K = 8, 3

    key = jax.random.PRNGKey(0)
    kx, kw, kb, kg, kbt, km, kv = jax.random.split(key, 7)
    x = jax.random.normal(kx, (N, Cin, H, W), jnp.float32)
    w = jax.random.normal(kw, (Cout, Cin, K, K), jnp.float32) * 0.1
    b = jax.random.normal(kb, (Cout,), jnp.float32) * 0.1
    gamma = 1.0 + 0.1 * jax.random.normal(kg, (Cout,), jnp.float32)
    beta = 0.1 * jax.random.normal(kbt, (Cout,), jnp.float32)
    run_mean = 0.1 * jax.random.normal(km, (Cout,), jnp.float32)
    run_var = jnp.abs(jax.random.normal(kv, (Cout,), jnp.float32)) + 0.5

    out = conv_block_forward(x, w, b, gamma, beta, run_mean, run_var)
    out = jax.block_until_ready(out)

    ref = _reference(x, w, b, gamma, beta, run_mean, run_var)
    assert out.shape == (N, Cout, H // 2, W // 2), out.shape
    assert jnp.allclose(out, ref, atol=1e-4, rtol=1e-4), float(jnp.max(jnp.abs(out - ref)))

    print("KERNEL_OK")
</pallas_src>

<mosaic_0001>
module attributes {stable_mosaic.version = 11 : i64} {
  func.func @_convblock_kernel(%arg0: i32, %arg1: memref<2x8x320xf32, #tpu.memory_space<vmem>>, %arg2: memref<8x72xf32, #tpu.memory_space<vmem>>, %arg3: memref<8x1xf32, #tpu.memory_space<vmem>>, %arg4: memref<3x256xf32, #tpu.memory_space<vmem>>, %arg5: memref<495x128xf32, #tpu.memory_space<vmem>>, %arg6: memref<1x8x128xf32, #tpu.memory_space<vmem>>, %arg7: memref<72x512xf32, #tpu.memory_space<vmem>>) attributes {dimension_semantics = [#tpu.dimension_semantics<parallel>], iteration_bounds = array<i64: 1>, scalar_prefetch = 0 : i64, scratch_operands = 1 : i64, tpu.core_type = #tpu.core_type<tc>, window_params = [{transform_indices = @transform_0, window_bounds = array<i64: 2, 8, 320>}, {pipeline_mode = #tpu.pipeline_mode<synchronous>, transform_indices = @transform_1, window_bounds = array<i64: 8, 72>}, {pipeline_mode = #tpu.pipeline_mode<synchronous>, transform_indices = @transform_2, window_bounds = array<i64: 8, 1>}, {pipeline_mode = #tpu.pipeline_mode<synchronous>, transform_indices = @transform_3, window_bounds = array<i64: 3, 256>}, {pipeline_mode = #tpu.pipeline_mode<synchronous>, transform_indices = @transform_4, window_bounds = array<i64: 495, 128>}, {transform_indices = @transform_5, window_bounds = array<i64: 1, 8, 128>}]} {
    %c0 = arith.constant 0 : index
    %c0_0 = arith.constant 0 : index
    %c0_1 = arith.constant 0 : index
    %0 = vector.load %arg1[%c0, %c0_0, %c0_1] : memref<2x8x320xf32, #tpu.memory_space<vmem>>, vector<1x8x320xf32>
    %1 = vector.shape_cast %0 : vector<1x8x320xf32> to vector<8x320xf32>
    %2 = vector.extract_strided_slice %1 {offsets = [0, 15], sizes = [8, 256], strides = [1, 1]} : vector<8x320xf32> to vector<8x256xf32>
    %c0_2 = arith.constant 0 : index
    %c0_3 = arith.constant 0 : index
    %3 = vector.load %arg4[%c0_2, %c0_3] : memref<3x256xf32, #tpu.memory_space<vmem>>, vector<1x256xf32>
    %4 = vector.broadcast %3 : vector<1x256xf32> to vector<8x256xf32>
    %5 = arith.mulf %2, %4 : vector<8x256xf32>
    %c0_4 = arith.constant 0 : index
    %c0_5 = arith.constant 0 : index
    %6 = vector.load %arg7[%c0_4, %c0_5] : memref<72x512xf32, #tpu.memory_space<vmem>>, vector<8x256xf32>
    tpu.vector_store %arg7[%c0_4, %c0_5], %5 {strides = array<i32>} : memref<72x512xf32, #tpu.memory_space<vmem>>, vector<8x256xf32>,
    %7 = vector.extract_strided_slice %1 {offsets = [0, 16], sizes = [8, 256], strides = [1, 1]} : vector<8x320xf32> to vector<8x256xf32>
    %c8 = arith.constant 8 : index
    %c0_6 = arith.constant 0 : index
    %8 = vector.load %arg7[%c8, %c0_6] : memref<72x512xf32, #tpu.memory_space<vmem>>, vector<8x256xf32>
    tpu.vector_store %arg7[%c8, %c0_6], %7 {strides = array<i32>} : memref<72x512xf32, #tpu.memory_space<vmem>>, vector<8x256xf32>,
    %9 = vector.extract_strided_slice %1 {offsets = [0, 17], sizes = [8, 256], strides = [1, 1]} : vector<8x320xf32> to vector<8x256xf32>
    %c2 = arith.constant 2 : index
    %c0_7 = arith.constant 0 : index
    %10 = vector.load %arg4[%c2, %c0_7] : memref<3x256xf32, #tpu.memory_space<vmem>>, vector<1x256xf32>
    %11 = vector.broadcast %10 : vector<1x256xf32> to vector<8x256xf32>
    %12 = arith.mulf %9, %11 : vector<8x256xf32>
    %c16 = arith.constant 16 : index
    %c0_8 = arith.constant 0 : index
    %13 = vector.load %arg7[%c16, %c0_8] : memref<72x512xf32, #tpu.memory_space<vmem>>, vector<8x256xf32>
    tpu.vector_store %arg7[%c16, %c0_8], %12 {strides = array<i32>} : memref<72x512xf32, #tpu.memory_space<vmem>>, vector<8x256xf32>,
    %14 = vector.extract_strided_slice %1 {offsets = [0, 31], sizes = [8, 256], strides = [1, 1]} : vector<8x320xf32> to vector<8x256xf32>
    %c0_9 = arith.constant 0 : index
    %c0_10 = arith.constant 0 : index
    %15 = vector.load %arg4[%c0_9, %c0_10] : memref<3x256xf32, #tpu.memory_space<vmem>>, vector<1x256xf32>
    %16 = vector.broadcast %15 : vector<1x256xf32> to vector<8x256xf32>
    %17 = arith.mulf %14, %16 : vector<8x256xf32>
    %c24 = arith.constant 24 : index
    %c0_11 = arith.constant 0 : index
    %18 = vector.load %arg7[%c24, %c0_11] : memref<72x512xf32, #tpu.memory_space<vmem>>, vector<8x256xf32>
    tpu.vector_store %arg7[%c24, %c0_11], %17 {strides = array<i32>} : memref<72x512xf32, #tpu.memory_space<vmem>>, vector<8x256xf32>,
    %19 = vector.extract_strided_slice %1 {offsets = [0, 32], sizes = [8, 256], strides = [1, 1]} : vector<8x320xf32> to vector<8x256xf32>
    %c32 = arith.constant 32 : index
    %c0_12 = arith.constant 0 : index
    %20 = vector.load %arg7[%c32, %c0_12] : memref<72x512xf32, #tpu.memory_space<vmem>>, vector<8x256xf32>
    tpu.vector_store %arg7[%c32, %c0_12], %19 {strides = array<i32>} : memref<72x512xf32, #tpu.memory_space<vmem>>, vector<8x256xf32>,
    %21 = vector.extract_strided_slice %1 {offsets = [0, 33], sizes = [8, 256], strides = [1, 1]} : vector<8x320xf32> to vector<8x256xf32>
    %c2_13 = arith.constant 2 : index
    %c0_14 = arith.constant 0 : index
    %22 = vector.load %arg4[%c2_13, %c0_14] : memref<3x256xf32, #tpu.memory_space<vmem>>, vector<1x256xf32>
    %23 = vector.broadcast %22 : vector<1x256xf32> to vector<8x256xf32>
    %24 = arith.mulf %21, %23 : vector<8x256xf32>
    %c40 = arith.constant 40 : index
    %c0_15 = arith.constant 0 : index
    %25 = vector.load %arg7[%c40, %c0_15] : memref<72x512xf32, #tpu.memory_space<vmem>>, vector<8x256xf32>
    tpu.vector_store %arg7[%c40, %c0_15], %24 {strides = array<i32>} : memref<72x512xf32, #tpu.memory_space<vmem>>, vector<8x256xf32>,
    %26 = vector.extract_strided_slice %1 {offsets = [0, 47], sizes = [8, 256], strides = [1, 1]} : vector<8x320xf32> to vector<8x256xf32>
    %c0_16 = arith.constant 0 : index
    %c0_17 = arith.constant 0 : index
    %27 = vector.load %arg4[%c0_16, %c0_17] : memref<3x256xf32, #tpu.memory_space<vmem>>, vector<1x256xf32>
    %28 = vector.broadcast %27 : vector<1x256xf32> to vector<8x256xf32>
    %29 = arith.mulf %26, %28 : vector<8x256xf32>
    %c48 = arith.constant 48 : index
    %c0_18 = arith.constant 0 : index
    %30 = vector.load %arg7[%c48, %c0_18] : memref<72x512xf32, #tpu.memory_space<vmem>>, vector<8x256xf32>
    tpu.vector_store %arg7[%c48, %c0_18], %29 {strides = array<i32>} : memref<72x512xf32, #tpu.memory_space<vmem>>, vector<8x256xf32>,
    %31 = vector.extract_strided_slice %1 {offsets = [0, 48], sizes = [8, 256], strides = [1, 1]} : vector<8x320xf32> to vector<8x256xf32>
    %c56 = arith.constant 56 : index
    %c0_19 = arith.constant 0 : index
    %32 = vector.load %arg7[%c56, %c0_19] : memref<72x512xf32, #tpu.memory_space<vmem>>, vector<8x256xf32>
    tpu.vector_store %arg7[%c56, %c0_19], %31 {strides = array<i32>} : memref<72x512xf32, #tpu.memory_space<vmem>>, vector<8x256xf32>,
    %33 = vector.extract_strided_slice %1 {offsets = [0, 49], sizes = [8, 256], strides = [1, 1]} : vector<8x320xf32> to vector<8x256xf32>
    %c2_20 = arith.constant 2 : index
    %c0_21 = arith.constant 0 : index
    %34 = vector.load %arg4[%c2_20, %c0_21] : memref<3x256xf32, #tpu.memory_space<vmem>>, vector<1x256xf32>
    %35 = vector.broadcast %34 : vector<1x256xf32> to vector<8x256xf32>
    %36 = arith.mulf %33, %35 : vector<8x256xf32>
    %c64 = arith.constant 64 : index
    %c0_22 = arith.constant 0 : index
    %37 = vector.load %arg7[%c64, %c0_22] : memref<72x512xf32, #tpu.memory_space<vmem>>, vector<8x256xf32>
    tpu.vector_store %arg7[%c64, %c0_22], %36 {strides = array<i32>} : memref<72x512xf32, #tpu.memory_space<vmem>>, vector<8x256xf32>,
    %c1 = arith.constant 1 : index
    %c0_23 = arith.constant 0 : index
    %c0_24 = arith.constant 0 : index
    %38 = vector.load %arg1[%c1, %c0_23, %c0_24] : memref<2x8x320xf32, #tpu.memory_space<vmem>>, vector<1x8x320xf32>
    %39 = vector.shape_cast %38 : vector<1x8x320xf32> to vector<8x320xf32>
    %40 = vector.extract_strided_slice %39 {offsets = [0, 15], sizes = [8, 256], strides = [1, 1]} : vector<8x320xf32> to vector<8x256xf32>
    %c0_25 = arith.constant 0 : index
    %c0_26 = arith.constant 0 : index
    %41 = vector.load %arg4[%c0_25, %c0_26] : memref<3x256xf32, #tpu.memory_space<vmem>>, vector<1x256xf32>
    %42 = vector.broadcast %41 : vector<1x256xf32> to vector<8x256xf32>
    %43 = arith.mulf %40, %42 : vector<8x256xf32>
    %c0_27 = arith.constant 0 : index
    %c256 = arith.constant 256 : index
    %44 = vector.load %arg7[%c0_27, %c256] : memref<72x512xf32, #tpu.memory_space<vmem>>, vector<8x256xf32>
    tpu.vector_store %arg7[%c0_27, %c256], %43 {strides = array<i32>} : memref<72x512xf32, #tpu.memory_space<vmem>>, vector<8x256xf32>,
    %45 = vector.extract_strided_slice %39 {offsets = [0, 16], sizes = [8, 256], strides = [1, 1]} : vector<8x320xf32> to vector<8x256xf32>
    %c8_28 = arith.constant 8 : index
    %c256_29 = arith.constant 256 : index
    %46 = vector.load %arg7[%c8_28, %c256_29] : memref<72x512xf32, #tpu.memory_space<vmem>>, vector<8x256xf32>
    tpu.vector_store %arg7[%c8_28, %c256_29], %45 {strides = array<i32>} : memref<72x512xf32, #tpu.memory_space<vmem>>, vector<8x256xf32>,
    %47 = vector.extract_strided_slice %39 {offsets = [0, 17], sizes = [8, 256], strides = [1, 1]} : vector<8x320xf32> to vector<8x256xf32>
    %c2_30 = arith.constant 2 : index
    %c0_31 = arith.constant 0 : index
    %48 = vector.load %arg4[%c2_30, %c0_31] : memref<3x256xf32, #tpu.memory_space<vmem>>, vector<1x256xf32>
    %49 = vector.broadcast %48 : vector<1x256xf32> to vector<8x256xf32>
    %50 = arith.mulf %47, %49 : vector<8x256xf32>
    %c16_32 = arith.constant 16 : index
    %c256_33 = arith.constant 256 : index
    %51 = vector.load %arg7[%c16_32, %c256_33] : memref<72x512xf32, #tpu.memory_space<vmem>>, vector<8x256xf32>
    tpu.vector_store %arg7[%c16_32, %c256_33], %50 {strides = array<i32>} : memref<72x512xf32, #tpu.memory_space<vmem>>, vector<8x256xf32>,
    %52 = vector.extract_strided_slice %39 {offsets = [0, 31], sizes = [8, 256], strides = [1, 1]} : vector<8x320xf32> to vector<8x256xf32>
    %c0_34 = arith.constant 0 : index
    %c0_35 = arith.constant 0 : index
    %53 = vector.load %arg4[%c0_34, %c0_35] : memref<3x256xf32, #tpu.memory_space<vmem>>, vector<1x256xf32>
    %54 = vector.broadcast %53 : vector<1x256xf32> to vector<8x256xf32>
    %55 = arith.mulf %52, %54 : vector<8x256xf32>
    %c24_36 = arith.constant 24 : index
    %c256_37 = arith.constant 256 : index
    %56 = vector.load %arg7[%c24_36, %c256_37] : memref<72x512xf32, #tpu.memory_space<vmem>>, vector<8x256xf32>
    tpu.vector_store %arg7[%c24_36, %c256_37], %55 {strides = array<i32>} : memref<72x512xf32, #tpu.memory_space<vmem>>, vector<8x256xf32>,
    %57 = vector.extract_strided_slice %39 {offsets = [0, 32], sizes = [8, 256], strides = [1, 1]} : vector<8x320xf32> to vector<8x256xf32>
    %c32_38 = arith.constant 32 : index
    %c256_39 = arith.constant 256 : index
    %58 = vector.load %arg7[%c32_38, %c256_39] : memref<72x512xf32, #tpu.memory_space<vmem>>, vector<8x256xf32>
    tpu.vector_store %arg7[%c32_38, %c256_39], %57 {strides = array<i32>} : memref<72x512xf32, #tpu.memory_space<vmem>>, vector<8x256xf32>,
    %59 = vector.extract_strided_slice %39 {offsets = [0, 33], sizes = [8, 256], strides = [1, 1]} : vector<8x320xf32> to vector<8x256xf32>
    %c2_40 = arith.constant 2 : index
    %c0_41 = arith.constant 0 : index
    %60 = vector.load %arg4[%c2_40, %c0_41] : memref<3x256xf32, #tpu.memory_space<vmem>>, vector<1x256xf32>
    %61 = vector.broadcast %60 : vector<1x256xf32> to vector<8x256xf32>
    %62 = arith.mulf %59, %61 : vector<8x256xf32>
    %c40_42 = arith.constant 40 : index
    %c256_43 = arith.constant 256 : index
    %63 = vector.load %arg7[%c40_42, %c256_43] : memref<72x512xf32, #tpu.memory_space<vmem>>, vector<8x256xf32>
    tpu.vector_store %arg7[%c40_42, %c256_43], %62 {strides = array<i32>} : memref<72x512xf32, #tpu.memory_space<vmem>>, vector<8x256xf32>,
    %64 = vector.extract_strided_slice %39 {offsets = [0, 47], sizes = [8, 256], strides = [1, 1]} : vector<8x320xf32> to vector<8x256xf32>
    %c0_44 = arith.constant 0 : index
    %c0_45 = arith.constant 0 : index
    %65 = vector.load %arg4[%c0_44, %c0_45] : memref<3x256xf32, #tpu.memory_space<vmem>>, vector<1x256xf32>
    %66 = vector.broadcast %65 : vector<1x256xf32> to vector<8x256xf32>
    %67 = arith.mulf %64, %66 : vector<8x256xf32>
    %c48_46 = arith.constant 48 : index
    %c256_47 = arith.constant 256 : index
    %68 = vector.load %arg7[%c48_46, %c256_47] : memref<72x512xf32, #tpu.memory_space<vmem>>, vector<8x256xf32>
    tpu.vector_store %arg7[%c48_46, %c256_47], %67 {strides = array<i32>} : memref<72x512xf32, #tpu.memory_space<vmem>>, vector<8x256xf32>,
    %69 = vector.extract_strided_slice %39 {offsets = [0, 48], sizes = [8, 256], strides = [1, 1]} : vector<8x320xf32> to vector<8x256xf32>
    %c56_48 = arith.constant 56 : index
    %c256_49 = arith.constant 256 : index
    %70 = vector.load %arg7[%c56_48, %c256_49] : memref<72x512xf32, #tpu.memory_space<vmem>>, vector<8x256xf32>
    tpu.vector_store %arg7[%c56_48, %c256_49], %69 {strides = array<i32>} : memref<72x512xf32, #tpu.memory_space<vmem>>, vector<8x256xf32>,
    %71 = vector.extract_strided_slice %39 {offsets = [0, 49], sizes = [8, 256], strides = [1, 1]} : vector<8x320xf32> to vector<8x256xf32>
    %c2_50 = arith.constant 2 : index
    %c0_51 = arith.constant 0 : index
    %72 = vector.load %arg4[%c2_50, %c0_51] : memref<3x256xf32, #tpu.memory_space<vmem>>, vector<1x256xf32>
    %73 = vector.broadcast %72 : vector<1x256xf32> to vector<8x256xf32>
    %74 = arith.mulf %71, %73 : vector<8x256xf32>
    %c64_52 = arith.constant 64 : index
    %c256_53 = arith.constant 256 : index
    %75 = vector.load %arg7[%c64_52, %c256_53] : memref<72x512xf32, #tpu.memory_space<vmem>>, vector<8x256xf32>
    tpu.vector_store %arg7[%c64_52, %c256_53], %74 {strides = array<i32>} : memref<72x512xf32, #tpu.memory_space<vmem>>, vector<8x256xf32>,
    %c0_54 = arith.constant 0 : index
    %c0_55 = arith.constant 0 : index
    %76 = vector.load %arg2[%c0_54, %c0_55] : memref<8x72xf32, #tpu.memory_space<vmem>>, vector<8x72xf32>
    %c0_56 = arith.constant 0 : index
    %c0_57 = arith.constant 0 : index
    %77 = vector.load %arg7[%c0_56, %c0_57] : memref<72x512xf32, #tpu.memory_space<vmem>>, vector<72x512xf32>
    %cst = arith.constant dense<0.000000e+00> : vector<8x512xf32>
    %78 = tpu.matmul %76, %77, %cst {dimension_numbers = #tpu.dot_dimension_numbers<[1], [0], [0], [1], [0, 0, 1, 1], [], []>} : vector<8x72xf32>, vector<72x512xf32>, vector<8x512xf32> -> vector<8x512xf32>
    %c0_58 = arith.constant 0 : index
    %c0_59 = arith.constant 0 : index
    %79 = vector.load %arg3[%c0_58, %c0_59] : memref<8x1xf32, #tpu.memory_space<vmem>>, vector<8x1xf32>
    %80 = vector.broadcast %79 : vector<8x1xf32> to vector<8x512xf32>
    %81 = arith.addf %78, %80 : vector<8x512xf32>
    %cst_60 = arith.constant 2.000000e+01 : f32
    %82 = vector.broadcast %cst_60 : f32 to vector<8x512xf32>
    %83 = arith.minimumf %81, %82 : vector<8x512xf32>
    %84 = math.exp %83 : vector<8x512xf32>
    %cst_61 = arith.constant 2.000000e+00 : f32
    %85 = vector.broadcast %cst_61 : f32 to vector<8x512xf32>
    %86 = arith.addf %84, %85 : vector<8x512xf32>
    %87 = arith.mulf %84, %86 : vector<8x512xf32>
    %cst_62 = arith.constant 2.000000e+00 : f32
    %88 = vector.broadcast %cst_62 : f32 to vector<8x512xf32>
    %89 = arith.addf %87, %88 : vector<8x512xf32>
    %90 = tpu.reciprocal %89 {approx = true} : vector<8x512xf32> -> vector<8x512xf32>
    %91 = arith.mulf %89, %90 : vector<8x512xf32>
    %cst_63 = arith.constant 2.000000e+00 : f32
    %92 = vector.broadcast %cst_63 : f32 to vector<8x512xf32>
    %93 = arith.subf %92, %91 : vector<8x512xf32>
    %94 = arith.mulf %90, %93 : vector<8x512xf32>
    %cst_64 = arith.constant 2.000000e+01 : f32
    %95 = vector.broadcast %cst_64 : f32 to vector<8x512xf32>
    %96 = arith.cmpf ogt, %81, %95 : vector<8x512xf32>
    %97 = arith.mulf %81, %87 : vector<8x512xf32>
    %98 = arith.mulf %97, %94 : vector<8x512xf32>
    %99 = arith.select %96, %81, %98 : vector<8x512xi1>, vector<8x512xf32>
    %100 = vector.extract_strided_slice %99 {offsets = [0, 0], sizes = [8, 511], strides = [1, 1]} : vector<8x512xf32> to vector<8x511xf32>
    %101 = vector.extract_strided_slice %99 {offsets = [0, 1], sizes = [8, 511], strides = [1, 1]} : vector<8x512xf32> to vector<8x511xf32>
    %102 = arith.maximumf %100, %101 : vector<8x511xf32>
    %103 = vector.extract_strided_slice %102 {offsets = [0, 0], sizes = [8, 495], strides = [1, 1]} : vector<8x511xf32> to vector<8x495xf32>
    %104 = vector.extract_strided_slice %102 {offsets = [0, 16], sizes = [8, 495], strides = [1, 1]} : vector<8x511xf32> to vector<8x495xf32>
    %105 = arith.maximumf %103, %104 : vector<8x495xf32>
    %c0_65 = arith.constant 0 : index
    %c0_66 = arith.constant 0 : index
    %106 = vector.load %arg5[%c0_65, %c0_66] : memref<495x128xf32, #tpu.memory_space<vmem>>, vector<495x128xf32>
    %cst_67 = arith.constant dense<0.000000e+00> : vector<8x128xf32>
    %107 = tpu.matmul %105, %106, %cst_67 {dimension_numbers = #tpu.dot_dimension_numbers<[1], [0], [0], [1], [0, 0, 1, 1], [], []>} : vector<8x495xf32>, vector<495x128xf32>, vector<8x128xf32> -> vector<8x128xf32>
    %c0_68 = arith.constant 0 : index
    %c0_69 = arith.constant 0 : index
    %c0_70 = arith.constant 0 : index
    %108 = vector.load %arg6[%c0_68, %c0_69, %c0_70] : memref<1x8x128xf32, #tpu.memory_space<vmem>>, vector<1x8x128xf32>
    %109 = vector.shape_cast %108 : vector<1x8x128xf32> to vector<8x128xf32>
    %110 = vector.shape_cast %107 : vector<8x128xf32> to vector<1x8x128xf32>
    tpu.vector_store %arg6[%c0_68, %c0_69, %c0_70], %110 {strides = array<i32>} : memref<1x8x128xf32, #tpu.memory_space<vmem>>, vector<1x8x128xf32>,
    return
  }
  func.func @transform_0(%arg0: i32) -> (i32, i32, i32) {
    %c0_i32 = arith.constant 0 : i32
    %c0_i32_0 = arith.constant 0 : i32
    %c0_i32_1 = arith.constant 0 : i32
    return %arg0, %c0_i32, %c0_i32_0 : i32, i32, i32
  }
  func.func @transform_1(%arg0: i32) -> (i32, i32) {
    %c0_i32 = arith.constant 0 : i32
    %c0_i32_0 = arith.constant 0 : i32
    %c0_i32_1 = arith.constant 0 : i32
    return %c0_i32, %c0_i32_0 : i32, i32
  }
  func.func @transform_2(%arg0: i32) -> (i32, i32) {
    %c0_i32 = arith.constant 0 : i32
    %c0_i32_0 = arith.constant 0 : i32
    %c0_i32_1 = arith.constant 0 : i32
    return %c0_i32, %c0_i32_0 : i32, i32
  }
  func.func @transform_3(%arg0: i32) -> (i32, i32) {
    %c0_i32 = arith.constant 0 : i32
    %c0_i32_0 = arith.constant 0 : i32
    %c0_i32_1 = arith.constant 0 : i32
    return %c0_i32, %c0_i32_0 : i32, i32
  }
  func.func @transform_4(%arg0: i32) -> (i32, i32) {
    %c0_i32 = arith.constant 0 : i32
    %c0_i32_0 = arith.constant 0 : i32
    %c0_i32_1 = arith.constant 0 : i32
    return %c0_i32, %c0_i32_0 : i32, i32
  }
  func.func @transform_5(%arg0: i32) -> (i32, i32, i32) {
    %c0_i32 = arith.constant 0 : i32
    %c0_i32_0 = arith.constant 0 : i32
    %c0_i32_1 = arith.constant 0 : i32
    return %arg0, %c0_i32, %c0_i32_0 : i32, i32, i32
  }
}

</mosaic_0001>

<bundles_post_ra>
// kernel: tpu_custom_call.1
= control target key start
LH: loop header
LB: loop body
LE: loop exit
PB: predicated region body
PF: predicated region fallthrough
CT: control target
= control target key end

     0   :  { %10 = vsyncpa [#allocation4], 0  ;;  %s1556_s0 = inlined_call_operand.hbm [shape: f32[2,8,320], index: 0, kind: input, shape index: {}]   ;;  %s1557_s1 = inlined_call_operand.vmem [shape: f32[8,72], index: 1, kind: input, shape index: {}]   ;;  %s1558_s2 = inlined_call_operand.vmem [shape: f32[8,1], index: 2, kind: input, shape index: {}]   ;;  %s1559_s3 = inlined_call_operand.hbm [shape: f32[3,256], index: 3, kind: input, shape index: {}]   ;;  %s1560_s4 = inlined_call_operand.hbm [shape: f32[495,128], index: 4, kind: input, shape index: {}]   ;;  %s1561_s5 = inlined_call_operand.hbm [shape: f32[1,8,128], index: 5, kind: output, shape index: {}]  }
   0x1   :  { %11 = vsyncpa [#allocation7], 0  ;;  %s35_s20 = sshll.u32 %s1559_s3, 4  ;;  %s36_s20 = int_to_ptr.hbm [resolvable:$true] %s35_s20 }
   0x2   :  { %12 = vsyncpa [#allocation5], 0  ;;  %s1216_s21 = smov [#allocation6]   ;;  %s17_s25 = sshll.u32 %s1556_s0, 4  ;;  %s18_s25 = int_to_ptr.hbm [resolvable:$true] %s17_s25 }
   0x3   :  { %s37_s22 = sshll.u32 %s1216_s21, 4  ;;  %s1217_s26 = smov [#allocation3]   ;;  %s38_s22 = int_to_ptr.vmem [resolvable:$true] %s37_s22 }
   0x4   :  { %40 = dma.hbm_to_vmem [thread:$0]  %s36_s20, 128, %s38_s22, [#allocation7]  }
   0x5   :  { %s19_s27 = sshll.u32 %s1217_s26, 4  ;;  %s1218_s28 = smov 384   ;;  %s20_s27 = int_to_ptr.vmem [resolvable:$true] %s19_s27 }
   0x6   :  { %s1219_s29 = smov 24   ;;  %s45_s3 = sshll.u32 %s1560_s4, 4  ;;  %s46_s3 = int_to_ptr.hbm [resolvable:$true] %s45_s3 }
   0x7   :  { %25 = dma.hbm_to_vmem [thread:$0]  %s18_s25, 768, %s20_s27, [#allocation4], %s1218_s28, %s1218_s28, %s1219_s29  }
   0x8   :  { %s1220_s7 = smov [#allocation8]   ;;  %s1221_s9 = smov 128  }
   0x9   :  { %s47_s8 = sshll.u32 %s1220_s7, 4  ;;  %s1222_s10 = smov 8   ;;  %s48_s8 = int_to_ptr.vmem [resolvable:$true] %s47_s8 }
   0xa   :  { %53 = dma.hbm_to_vmem [thread:$0]  %s46_s3, 7936, %s48_s8, [#allocation7], %s1221_s9, %s1221_s9, %s1222_s10  }
   0xb   :  { %1210 = dma.done.wait [#allocation4], 768  }
   0xc   :  { %1211 = vsyncadd [#allocation4], 4294966528 }
   0xd   :  { %1212 = dma.done.wait [#allocation7], 8064  }
   0xe   :  { %1213 = vsyncadd [#allocation7], 4294959232  ;;  %v497_v0 = vld [vmem:[#allocation6 + $0x2] ss:$4 sm:$0x3]  ;;  %s1223_s0 = smov 49  }
   0xf   :  { %v455_v1 = vld [vmem:[#allocation6] ss:$4 sm:$0x3]  ;;  %v499_v2 = vperm.slane %v497_v0, 0  ;;  %s1224_s11 = smov 47   ;;  %s1225_s4 = smov 33  }
  0x10   :  { %v457_v3 = vperm.slane %v455_v1, 0  ;;  %v425_v4 = vld [vmem:[#allocation6 + $0x2] ss:$4 sm:$0x3]  ;;  %v500_v6 = vperm.slane %v497_v0, 1  ;;  %v458_v7 = vperm.slane %v455_v1, 1 }
  0x11   :  { %501 = vrot.lane.b32.xlu0 %v499_v2, %s1223_s0  ;;  %v427_v5 = vperm.slane %v425_v4, 0  ;;  %v428_v8 = vperm.slane %v425_v4, 1  ;;  %v272_v9 = vld [vmem:[#allocation6 + $0x2] ss:$4 sm:$0x3]  ;;  %s1226_s12 = smov 31  }
  0x12   :  { %459 = vrot.lane.b32.xlu1 %v457_v3, %s1224_s11  ;;  %v383_v10 = vld [vmem:[#allocation6] ss:$4 sm:$0x3]  ;;  %v275_v11 = vperm.slane %v272_v9, 1  ;;  %v274_v12 = vperm.slane %v272_v9, 0  ;;  %s1227_s13 = smov 17  }
  0x13   :  { %429 = vrot.lane.b32.xlu2 %v427_v5, %s1225_s4  ;;  %v385_v13 = vperm.slane %v383_v10, 0  ;;  %v353_v14 = vld [vmem:[#allocation6 + $0x2] ss:$4 sm:$0x3]  ;;  %v386_v16 = vperm.slane %v383_v10, 1  ;;  %s1228_s14 = smov 15  }
  0x14   :  { %v355_v15 = vperm.slane %v353_v14, 0  ;;  %v356_v17 = vperm.slane %v353_v14, 1  ;;  %v227_v18 = vld [vmem:[#allocation6] ss:$4 sm:$0x3]  ;;  %v1292_v36 = vld [vmem:[#allocation3 + $0x18] sm:$0xff] }
  0x15   :  { %v195_v19 = vld [vmem:[#allocation6 + $0x2] ss:$4 sm:$0x3]  ;;  %v230_v20 = vperm.slane %v227_v18, 1  ;;  %v229_v21 = vperm.slane %v227_v18, 0  ;;  %v1294_v37 = vld [vmem:[#allocation3 + $0x20] sm:$0xff] }
  0x16   :  { %v197_v22 = vperm.slane %v195_v19, 0  ;;  %v308_v23 = vld [vmem:[#allocation6] ss:$4 sm:$0x3]  ;;  %v198_v25 = vperm.slane %v195_v19, 1  ;;  %v956_v39 = vpack.i.bf16 %v1294_v37, %v1292_v36  ;;  %v1298_v40 = vld [vmem:[#allocation3 + $0x8] sm:$0xff] }
  0x17   :  { %v310_v24 = vperm.slane %v308_v23, 0  ;;  %v311_v26 = vperm.slane %v308_v23, 1  ;;  %v150_v27 = vld [vmem:[#allocation6] ss:$4 sm:$0x3]  ;;  %s1229_s15 = smov 80  }
  0x18   :  { %v118_v28 = vld [vmem:[#allocation6 + $0x2] ss:$4 sm:$0x3]  ;;  %v153_v29 = vperm.slane %v150_v27, 1  ;;  %v152_v30 = vperm.slane %v150_v27, 0  ;;  %vm203_vm0 = vcmask 269312  }
  0x19   :  { %503 = vrot.lane.b32.xlu0 %v500_v6, %s1223_s0  ;;  %v120_v31 = vperm.slane %v118_v28, 0  ;;  %v121_v32 = vperm.slane %v118_v28, 1  ;;  %v69_v33 = vld [vmem:[#allocation6] ss:$4 sm:$0x3]  ;;  %s1230_s16 = smov 96  }
  0x1a   :  { %461 = vrot.lane.b32.xlu1 %v458_v7, %s1224_s11  ;;  %v71_v34 = vperm.slane %v69_v33, 0  ;;  %v72_v35 = vperm.slane %v69_v33, 1  ;;  %v1300_v41 = vld [vmem:[#allocation3 + $0x10] sm:$0xff]  ;;  %v1317_v48 = vld [vmem:[#allocation3 + $0x28] sm:$0xff]  ;;  %v1319_v49 = vld [vmem:[#allocation3] sm:$0xff]  ;;  %s1231_s17 = smov 112  }
  0x1b   :  { %431 = vrot.lane.b32.xlu2 %v428_v8, %s1225_s4  ;;  %v1307_v43 = vpack.i.bf16 %v1300_v41, %v1298_v40  ;;  %v961_v50 = vpack.i.bf16 %v1319_v49, %v1317_v48  ;;  %vm280_vm1 = vcmask 400384   ;;  %s1232_s18 = smov 79   ;;  %vm126_vm2 = vcmask 138240   ;;  %s1233_s19 = smov 95  }
  0x1c   :  { %vm235_vm3 = vcmask 384000   ;;  %vm158_vm4 = vcmask 252928   ;;  %s1234_s20 = smov 81   ;;  %vm77_vm5 = vcmask 121856   ;;  %s1235_s21 = smov 97   ;;  %vm297_vm6 = vcmask 646144  }
  0x1d   :  { %s1236_s22 = smov 111   ;;  %s1237_s23 = smov 113   ;;  %vm265_vm7 = vcmask 654336   ;;  %vm252_vm8 = vcmask 662528   ;;  %vm220_vm9 = vcmask 777216   ;;  %vm188_vm10 = vcmask 785408  }
  0x1e   :  { %vm175_vm11 = vcmask 793600   ;;  %vm143_vm12 = vcmask 908288   ;;  %vm110_vm13 = vcmask 916480   ;;  %vm94_vm14 = vcmask 924672   ;;  %s1240_s27 = smov [#allocation9]   ;;  %s914_s6 = sshll.u32 %s1561_s5, 4  ;;  %s915_s6 = int_to_ptr.hbm [resolvable:$true] %s914_s6 }
  0x1f   :  { %vm570_vm15 = vcmask 588800   ;;  %s912_s28 = sshll.u32 %s1240_s27, 4  ;;  %s913_s28 = int_to_ptr.vmem [resolvable:$true] %s912_s28 }
  0x21   :  { %276 = vrot.lane.b32.xlu0 %v274_v12, %s1223_s0 }
  0x22   :  { %278 = vrot.lane.b32.xlu1 %v275_v11, %s1223_s0 }
  0x23   :  { %387 = vrot.lane.b32.xlu2 %v385_v13, %s1226_s12 }
  0x29   :  { %389 = vrot.lane.b32.xlu0 %v386_v16, %s1226_s12 }
  0x2a   :  { %357 = vrot.lane.b32.xlu1 %v355_v15, %s1227_s13 }
  0x2b   :  { %359 = vrot.lane.b32.xlu2 %v356_v17, %s1227_s13 }
  0x31   :  { %231 = vrot.lane.b32.xlu0 %v229_v21, %s1224_s11 }
  0x32   :  { %233 = vrot.lane.b32.xlu1 %v230_v20, %s1224_s11 }
  0x33   :  { %199 = vrot.lane.b32.xlu2 %v197_v22, %s1225_s4 }
  0x39   :  { %201 = vrot.lane.b32.xlu0 %v198_v25, %s1225_s4 }
  0x3a   :  { %312 = vrot.lane.b32.xlu1 %v310_v24, %s1228_s14 }
  0x3b   :  { %314 = vrot.lane.b32.xlu2 %v311_v26, %s1228_s14 }
  0x41   :  { %154 = vrot.lane.b32.xlu0 %v152_v30, %s1226_s12 }
  0x42   :  { %156 = vrot.lane.b32.xlu1 %v153_v29, %s1226_s12 }
  0x43   :  { %122 = vrot.lane.b32.xlu2 %v120_v31, %s1227_s13 }
  0x49   :  { %124 = vrot.lane.b32.xlu0 %v121_v32, %s1227_s13 }
  0x4a   :  { %73 = vrot.lane.b32.xlu1 %v71_v34, %s1228_s14 }
  0x4b   :  { %75 = vrot.lane.b32.xlu2 %v72_v35, %s1228_s14 }
  0x51   :  { %962 = vrot.lane.b32.xlu0 %v961_v50, %s1229_s15 }
  0x52   :  { %977 = vrot.lane.b32.xlu1 %v1307_v43, %s1229_s15 }
  0x53   :  { %957 = vrot.lane.b32.xlu2 %v956_v39, %s1229_s15 }
  0x59   :  { %972 = vrot.lane.b32.xlu0 %v961_v50, %s1230_s16 }
  0x5b   :  { %967 = vrot.lane.b32.xlu2 %v956_v39, %s1230_s16 }
  0x61   :  { %987 = vrot.lane.b32.xlu0 %v961_v50, %s1231_s17 }
  0x63   :  { %982 = vrot.lane.b32.xlu2 %v956_v39, %s1231_s17 }
  0x6d   :  { %v430_v38 = vpop.permute.xlu2 %429 }
  0x6e   :  { %v1303_v42 = vmul.f32 %v430_v38, %v1292_v36 }
  0x75   :  { %v432_v44 = vpop.permute.xlu2 %431 }
  0x76   :  { %v433_v45 = vsel %vm203_vm0, %v430_v38, %v432_v44  ;;  %v439_v3 = vmul.f32 %v432_v44, %v1317_v48 }
  0x77   :  { %v1312_v46 = vmul.f32 %v433_v45, %v1294_v37 }
  0x79   :  { %v1026_v47 = vpack.i.bf16 %v1312_v46, %v1303_v42 }
  0x7d   :  { %v388_v51 = vpop.permute.xlu2 %387 }
  0x7e   :  { %v395_v22 = vmul.f32 %v388_v51, %v1292_v36 }
  0x83   :  { %v502_v52 = vpop.permute.xlu0 %501 }
  0x84   :  { %v460_v53 = vpop.permute.xlu1 %459  ;;  %v1325_v54 = vmul.f32 %v502_v52, %v1292_v36 }
  0x85   :  { %v1332_v59 = vpop.permute.xlu2 %359  ;;  %v467_v13 = vmul.f32 %v460_v53, %v1292_v36 }
  0x8b   :  { %v504_v55 = vpop.permute.xlu0 %503 }
  0x8c   :  { %v462_v56 = vpop.permute.xlu1 %461  ;;  %v505_v57 = vsel %vm280_vm1, %v502_v52, %v504_v55  ;;  %v511_v63 = vmul.f32 %v504_v55, %v1317_v48  ;;  %v367_v52 = vmul.f32 %v1332_v59, %v1317_v48 }
  0x8d   :  { %v1330_v58 = vmul.f32 %v505_v57, %v1294_v37  ;;  %v1339_v2 = vpop.permute.xlu2 %199  ;;  %v463_v9 = vsel %vm235_vm3, %v460_v53, %v462_v56  ;;  %v469_v15 = vmul.f32 %v462_v56, %v1317_v48 }
  0x8e   :  { %v208_v4 = vmul.f32 %v1339_v2, %v1319_v49  ;;  %v468_v14 = vmul.f32 %v463_v9, %v1294_v37 }
  0x8f   :  { %v1016_v60 = vpack.i.bf16 %v1330_v58, %v1325_v54 }
  0x90   :  { %v1001_v11 = vpack.i.bf16 %v208_v4, %v439_v3  ;;  %v1021_v19 = vpack.i.bf16 %v468_v14, %v467_v13 }
  0x93   :  { %v277_v62 = vpop.permute.xlu0 %276 }
  0x94   :  { %v279_v61 = vpop.permute.xlu1 %278  ;;  %v285_v0 = vmul.f32 %v277_v62, %v1319_v49 }
  0x95   :  { %v315_v24 = vpop.permute.xlu2 %314  ;;  %v281_v31 = vsel %vm280_vm1, %v277_v62, %v279_v61  ;;  %v287_v33 = vmul.f32 %v279_v61, %v1300_v41 }
  0x96   :  { %v991_v1 = vpack.i.bf16 %v285_v0, %v511_v63  ;;  %v286_v34 = vmul.f32 %v281_v31, %v1298_v40 }
  0x98   :  { %992 = vrot.lane.b32.xlu1 %v991_v1, %s1232_s18  ;;  %v1036_v39 = vpack.i.bf16 %v287_v33, %v286_v34 }
  0x9b   :  { %v390_v6 = vpop.permute.xlu0 %389 }
  0x9c   :  { %v358_v5 = vpop.permute.xlu1 %357  ;;  %v391_v21 = vsel %vm158_vm4, %v388_v51, %v390_v6  ;;  %v397_v38 = vmul.f32 %v390_v6, %v1317_v48 }
  0x9d   :  { %v361_v7 = vsel %vm126_vm2, %v358_v5, %v1332_v59  ;;  %v365_v8 = vmul.f32 %v358_v5, %v1292_v36  ;;  %v396_v23 = vmul.f32 %v391_v21, %v1294_v37  ;;  %v123_v45 = vpop.permute.xlu2 %122 }
  0x9e   :  { %v366_v10 = vmul.f32 %v361_v7, %v1294_v37  ;;  %v131_v53 = vmul.f32 %v123_v45, %v1319_v49 }
  0x9f   :  { %v1041_v30 = vpack.i.bf16 %v396_v23, %v395_v22 }
  0xa0   :  { %v1046_v12 = vpack.i.bf16 %v366_v10, %v365_v8  ;;  %1002 = vrot.lane.b32.xlu1 %v1001_v11, %s1233_s19  ;;  %v1011_v57 = vpack.i.bf16 %v131_v53, %v367_v52 }
  0xa3   :  { %v232_v17 = vpop.permute.xlu0 %231 }
  0xa4   :  { %v234_v16 = vpop.permute.xlu1 %233  ;;  %v240_v18 = vmul.f32 %v232_v17, %v1319_v49 }
  0xa5   :  { %v236_v44 = vsel %vm235_vm3, %v232_v17, %v234_v16  ;;  %v242_v50 = vmul.f32 %v234_v16, %v1300_v41  ;;  %v76_v4 = vpop.permute.xlu2 %75 }
  0xa6   :  { %v996_v20 = vpack.i.bf16 %v240_v18, %v469_v15  ;;  %v241_v51 = vmul.f32 %v236_v44, %v1298_v40 }
  0xa8   :  { %997 = vrot.lane.b32.xlu2 %v996_v20, %s1234_s20  ;;  %1022 = vrot.lane.b32.xlu1 %v1021_v19, %s1234_s20  ;;  %v1051_v56 = vpack.i.bf16 %v242_v50, %v241_v51 }
  0xab   :  { %v202_v26 = vpop.permute.xlu0 %201 }
  0xac   :  { %v313_v25 = vpop.permute.xlu1 %312  ;;  %v204_v61 = vsel %vm203_vm0, %v1339_v2, %v202_v26  ;;  %v210_v59 = vmul.f32 %v202_v26, %v1300_v41 }
  0xad   :  { %v316_v27 = vsel %vm77_vm5, %v313_v25, %v315_v24  ;;  %v320_v28 = vmul.f32 %v313_v25, %v1292_v36  ;;  %v209_v63 = vmul.f32 %v204_v61, %v1298_v40  ;;  %v1414_v42 = vpop.permute.xlu2 %957 }
  0xae   :  { %v321_v29 = vmul.f32 %v316_v27, %v1294_v37  ;;  %v960_v44 = vunpack.i.h.bf16 %v1414_v42 }
  0xaf   :  { %v1056_v5 = vpack.i.bf16 %v210_v59, %v209_v63 }
  0xb0   :  { %v1066_v32 = vpack.i.bf16 %v321_v29, %v320_v28  ;;  %1042 = vrot.lane.b32.xlu2 %v1041_v30, %s1235_s21  ;;  %1032 = vrot.lane.b32.xlu1 %v1307_v43, %s1230_s16 }
  0xb3   :  { %v155_v35 = vpop.permute.xlu0 %154 }
  0xb4   :  { %v163_v36 = vmul.f32 %v155_v35, %v1319_v49  ;;  %v157_v55 = vpop.permute.xlu1 %156 }
  0xb5   :  { %v159_v62 = vsel %vm158_vm4, %v155_v35, %v157_v55  ;;  %v165_v0 = vmul.f32 %v157_v55, %v1300_v41  ;;  %v1416_v46 = vpop.permute.xlu2 %967  ;;  %vm822_vm4 = vcmask 1046528  }
  0xb6   :  { %v1006_v37 = vpack.i.bf16 %v163_v36, %v397_v38  ;;  %v164_v1 = vmul.f32 %v159_v62, %v1298_v40 }
  0xb8   :  { %1047 = vrot.lane.b32.xlu2 %v1046_v12, %s1236_s22  ;;  %1037 = vrot.lane.b32.xlu1 %v1036_v39, %s1232_s18  ;;  %v1071_v6 = vpack.i.bf16 %v165_v0, %v164_v1 }
  0xb9   :  { %1007 = vrot.lane.b32.xlu0 %v1006_v37, %s1235_s21 }
  0xbb   :  { %v125_v10 = vpop.permute.xlu0 %124 }
  0xbc   :  { %v74_v3 = vpop.permute.xlu1 %73  ;;  %v127_v11 = vsel %vm126_vm2, %v123_v45, %v125_v10  ;;  %v133_v58 = vmul.f32 %v125_v10, %v1300_v41  ;;  %v959_v45 = vunpack.i.l.bf16 %v1414_v42 }
  0xbd   :  { %v78_v2 = vsel %vm77_vm5, %v74_v3, %v76_v4  ;;  %v82_v7 = vmul.f32 %v74_v3, %v1319_v49  ;;  %v322_v49 = vmul.f32 %v315_v24, %v1317_v48  ;;  %v132_v54 = vmul.f32 %v127_v11, %v1298_v40  ;;  %v1418_v48 = vpop.permute.xlu2 %982 }
  0xbe   :  { %v83_v8 = vmul.f32 %v78_v2, %v1298_v40  ;;  %vm722_vm5 = vcmask 1039360  }
  0xc0   :  { %1067 = vrot.lane.b32.xlu2 %v1066_v32, %s1237_s23  ;;  %1052 = vrot.lane.b32.xlu1 %v1051_v56, %s1234_s20  ;;  %v1081_v9 = vpack.i.bf16 %v83_v8, %v82_v7 }
  0xc1   :  { %1012 = vrot.lane.b32.xlu0 %v1011_v57, %s1236_s22 }
  0xc3   :  { %v1422_v13 = vpop.permute.xlu0 %962 }
  0xc4   :  { %v965_v24 = vunpack.i.h.bf16 %v1422_v13  ;;  %v964_v50 = vunpack.i.l.bf16 %v1422_v13  ;;  %v564_v13 = vld [vmem:[%s1558_s2] sm:$0xff] }
  0xc8   :  { %1072 = vrot.lane.b32.xlu2 %v1071_v6, %s1235_s21  ;;  %1057 = vrot.lane.b32.xlu1 %v1056_v5, %s1233_s19 }
  0xc9   :  { %1017 = vrot.lane.b32.xlu0 %v1016_v60, %s1232_s18  ;;  %v1076_v60 = vpack.i.bf16 %v133_v58, %v132_v54  ;;  %v491_v58 = vsel %vm265_vm7, %v959_v45, %v960_v44 }
  0xcb   :  { %v1428_v15 = vpop.permute.xlu0 %972 }
  0xcc   :  { %v975_v53 = vunpack.i.h.bf16 %v1428_v15 }
  0xd0   :  { %1062 = vrot.lane.b32.xlu1 %v1307_v43, %s1231_s17  ;;  %1082 = vrot.lane.b32.xlu2 %v1081_v9, %s1237_s23  ;;  %v84_v43 = vmul.f32 %v76_v4, %v1300_v41 }
  0xd1   :  { %1027 = vrot.lane.b32.xlu0 %v1026_v47, %s1233_s19  ;;  %v978_v47 = vpop.permute.xlu1 %977 }
  0xd2   :  { %v980_v20 = vunpack.i.h.bf16 %v978_v47  ;;  %v979_v21 = vunpack.i.l.bf16 %v978_v47 }
  0xd3   :  { %v1434_v17 = vpop.permute.xlu0 %987 }
  0xd4   :  { %v266_v31 = vsel %vm265_vm7, %v965_v24, %v979_v21  ;;  %v267_v32 = vsel %vm265_vm7, %v979_v21, %v980_v20  ;;  %v969_v20 = vunpack.i.l.bf16 %v1416_v46  ;;  %v1238_v24 = vmov 0  }
  0xd5   :  { %1086 = vset.pattern.permute.xlu1 %v1238_v24  ;;  %1097 = vset.pattern.permute.xlu0 %v1238_v24 }
  0xd8   :  { %567 = vperm.xlu1 %1086, %v564_v13  }
  0xd9   :  { %330 = vrot.lane.b32.xlu0 %v322_v49, %s1237_s23 }
  0xe1   :  { %1077 = vrot.lane.b32.xlu0 %v1076_v60, %s1236_s22  ;;  %v492_v60 = vsel %vm265_vm7, %v960_v44, %v964_v50 }
  0xe9   :  { %92 = vrot.lane.b32.xlu0 %v84_v43, %s1237_s23 }
 0x102   :  { %v1424_v40 = vpop.permute.xlu2 %997 }
 0x103   :  { %v1000_v34 = vunpack.i.h.bf16 %v1424_v40  ;;  %v999_v54 = vunpack.i.l.bf16 %v1424_v40  ;;  %v970_v40 = vunpack.i.h.bf16 %v1416_v46 }
 0x10a   :  { %v1420_v12 = vpop.permute.xlu1 %992  ;;  %v1432_v16 = vpop.permute.xlu2 %1042 }
 0x10b   :  { %v995_v23 = vunpack.i.h.bf16 %v1420_v12  ;;  %v994_v59 = vunpack.i.l.bf16 %v1420_v12 }
 0x112   :  { %v1426_v14 = vpop.permute.xlu1 %1002  ;;  %v1438_v19 = vpop.permute.xlu2 %1047 }
 0x113   :  { %v1005_v52 = vunpack.i.h.bf16 %v1426_v14  ;;  %v1004_v21 = vunpack.i.l.bf16 %v1426_v14  ;;  %v1050_v14 = vunpack.i.h.bf16 %v1438_v19 }
 0x11a   :  { %v1430_v41 = vpop.permute.xlu1 %1022  ;;  %v1446_v30 = vpop.permute.xlu2 %1067 }
 0x11b   :  { %v1025_v7 = vunpack.i.h.bf16 %v1430_v41  ;;  %v1024_v8 = vunpack.i.l.bf16 %v1430_v41  ;;  %v974_v41 = vunpack.i.l.bf16 %v1428_v15 }
 0x11d   :  { %v479_v47 = vsel %vm252_vm8, %v1024_v8, %v1025_v7  ;;  %v480_v12 = vsel %vm252_vm8, %v1025_v7, %v999_v54  ;;  %v420_v46 = vsel %vm188_vm10, %v970_v40, %v974_v41 }
 0x122   :  { %v1436_v18 = vpop.permute.xlu1 %1032  ;;  %v1073_v51 = vpop.permute.xlu2 %1072 }
 0x123   :  { %v1035_v56 = vunpack.i.h.bf16 %v1436_v18  ;;  %v1034_v57 = vunpack.i.l.bf16 %v1436_v18  ;;  %v1075_v0 = vunpack.i.h.bf16 %v1073_v51  ;;  %v1074_v4 = vunpack.i.l.bf16 %v1073_v51  ;;  %v527_v51 = vld [vmem:[%s1557_s1] sm:$0xff]  ;;  %s1239_s1 = smov 127  }
 0x125   :  { %v189_v49 = vsel %vm188_vm10, %v975_v53, %v1034_v57  ;;  %v190_v11 = vsel %vm188_vm10, %v1034_v57, %v1035_v56  ;;  %v177_v42 = vsel %vm175_vm11, %v1074_v4, %v1075_v0  ;;  %v990_v0 = vunpack.i.h.bf16 %v1434_v17 }
 0x12a   :  { %v1038_v22 = vpop.permute.xlu1 %1037  ;;  %v1083_v56 = vpop.permute.xlu2 %1082 }
 0x12b   :  { %v1040_v25 = vunpack.i.h.bf16 %v1038_v22  ;;  %v1039_v26 = vunpack.i.l.bf16 %v1038_v22  ;;  %v1442_v27 = vpop.permute.xlu0 %1007 }
 0x12c   :  { %v1010_v2 = vunpack.i.h.bf16 %v1442_v27 }
 0x12d   :  { %v298_v28 = vsel %vm297_vm6, %v995_v23, %v1039_v26  ;;  %v299_v29 = vsel %vm297_vm6, %v1039_v26, %v1040_v25  ;;  %v1045_v25 = vunpack.i.h.bf16 %v1432_v16  ;;  %v1044_v26 = vunpack.i.l.bf16 %v1432_v16 }
 0x12e   :  { %581 = vmatpush.msra.mxu0 %v298_v28  ;;  %601 = vmatpush.msra.mxu1 %v299_v29  ;;  %v176_v43 = vsel %vm175_vm11, %v1010_v2, %v1074_v4  ;;  %v1009_v28 = vunpack.i.l.bf16 %v1442_v27  ;;  %v985_v16 = vunpack.i.h.bf16 %v1418_v48  ;;  %v984_v27 = vunpack.i.l.bf16 %v1418_v48 }
 0x130   :  { %582 = vmatpush.msra.mxu0 %v266_v31  ;;  %602 = vmatpush.msra.mxu1 %v267_v32  ;;  %v1049_v31 = vunpack.i.l.bf16 %v1438_v19  ;;  %v1070_v19 = vunpack.i.h.bf16 %v1446_v30  ;;  %v347_v48 = vsel %vm110_vm13, %v984_v27, %v985_v16 }
 0x132   :  { %v1053_v33 = vpop.permute.xlu1 %1052  ;;  %v377_v44 = vsel %vm143_vm12, %v1049_v31, %v1050_v14 }
 0x133   :  { %v1055_v35 = vunpack.i.h.bf16 %v1053_v33  ;;  %v1054_v38 = vunpack.i.l.bf16 %v1053_v33  ;;  %v1451_v36 = vpop.permute.xlu0 %1012  ;;  %v419_v33 = vsel %vm188_vm10, %v969_v20, %v970_v40 }
 0x134   :  { %v1014_v32 = vunpack.i.l.bf16 %v1451_v36 }
 0x135   :  { %v253_v37 = vsel %vm252_vm8, %v1000_v34, %v1054_v38  ;;  %v254_v39 = vsel %vm252_vm8, %v1054_v38, %v1055_v35  ;;  %v989_v34 = vunpack.i.l.bf16 %v1434_v17  ;;  %v407_v35 = vsel %vm175_vm11, %v1044_v26, %v1045_v25 }
 0x136   :  { %583 = vmatpush.msra.mxu0 %v253_v37  ;;  %603 = vmatpush.msra.mxu1 %v254_v39  ;;  %v408_v38 = vsel %vm175_vm11, %v1045_v25, %v1009_v28  ;;  %v1069_v39 = vunpack.i.l.bf16 %v1446_v30  ;;  %v378_v45 = vsel %vm143_vm12, %v1050_v14, %v1014_v32 }
 0x137   :  { %v348_v50 = vsel %vm110_vm13, %v985_v16, %v989_v34 }
 0x138   :  { %v332_v30 = vsel %vm94_vm14, %v1069_v39, %v1070_v19 }
 0x13a   :  { %v1058_v55 = vpop.permute.xlu1 %1057 }
 0x13b   :  { %v1060_v61 = vunpack.i.h.bf16 %v1058_v55  ;;  %v1059_v62 = vunpack.i.l.bf16 %v1058_v55  ;;  %v1018_v63 = vpop.permute.xlu0 %1017 }
 0x13c   :  { %v1020_v1 = vunpack.i.h.bf16 %v1018_v63  ;;  %v1019_v3 = vunpack.i.l.bf16 %v1018_v63 }
 0x13d   :  { %v221_v5 = vsel %vm220_vm9, %v1005_v52, %v1059_v62  ;;  %v222_v6 = vsel %vm220_vm9, %v1059_v62, %v1060_v61  ;;  %v1015_v61 = vunpack.i.h.bf16 %v1451_v36 }
 0x13e   :  { %584 = vmatpush.msra.mxu0 %v221_v5  ;;  %604 = vmatpush.msra.mxu1 %v222_v6  ;;  %v521_v9 = vsel %vm297_vm6, %v1019_v3, %v1020_v1  ;;  %v522_v10 = vsel %vm297_vm6, %v1020_v1, %v994_v59  ;;  %v1085_v1 = vunpack.i.h.bf16 %v1083_v56  ;;  %v1084_v3 = vunpack.i.l.bf16 %v1083_v56 }
 0x13f   :  { %621 = vmatpush.msra.mxu2 %v521_v9  ;;  %641 = vmatpush.msra.mxu3 %v522_v10 }
 0x140   :  { %585 = vmatpush.msra.mxu0 %v189_v49  ;;  %605 = vmatpush.msra.mxu1 %v190_v11  ;;  %v95_v36 = vsel %vm94_vm14, %v1084_v3, %v1085_v1 }
 0x141   :  { %622 = vmatpush.msra.mxu2 %v491_v58  ;;  %642 = vmatpush.msra.mxu3 %v492_v60 }
 0x142   :  { %586 = vmatpush.msra.mxu0 %v176_v43  ;;  %606 = vmatpush.msra.mxu1 %v177_v42  ;;  %v1063_v53 = vpop.permute.xlu1 %1062 }
 0x143   :  { %v1028_v18 = vpop.permute.xlu0 %1027  ;;  %623 = vmatpush.msra.mxu2 %v479_v47  ;;  %643 = vmatpush.msra.mxu3 %v480_v12  ;;  %v1065_v55 = vunpack.i.h.bf16 %v1063_v53  ;;  %v1064_v62 = vunpack.i.l.bf16 %v1063_v53 }
 0x144   :  { %v1030_v22 = vunpack.i.h.bf16 %v1028_v18  ;;  %v1029_v23 = vunpack.i.l.bf16 %v1028_v18 }
 0x145   :  { %v112_v5 = vsel %vm110_vm13, %v1064_v62, %v1065_v55  ;;  %v111_v6 = vsel %vm110_vm13, %v990_v0, %v1064_v62 }
 0x146   :  { %v449_v15 = vsel %vm220_vm9, %v1029_v23, %v1030_v22  ;;  %v450_v29 = vsel %vm220_vm9, %v1030_v22, %v1004_v21 }
 0x147   :  { %624 = vmatpush.msra.mxu2 %v449_v15  ;;  %644 = vmatpush.msra.mxu3 %v450_v29 }
 0x149   :  { %625 = vmatpush.msra.mxu2 %v419_v33  ;;  %645 = vmatpush.msra.mxu3 %v420_v46 }
 0x14a   :  { %v568_v8 = vpop.permute.xlu1 %567 }
 0x14b   :  { %v331_v37 = vpop.permute.xlu0 %330  ;;  %626 = vmatpush.msra.mxu2 %v407_v35  ;;  %646 = vmatpush.msra.mxu3 %v408_v38 }
 0x14c   :  { %v333_v52 = vsel %vm94_vm14, %v1070_v19, %v331_v37 }
 0x14d   :  { %627 = vmatpush.msra.mxu2 %v377_v44  ;;  %647 = vmatpush.msra.mxu3 %v378_v45 }
 0x14f   :  { %628 = vmatpush.msra.mxu2 %v347_v48  ;;  %648 = vmatpush.msra.mxu3 %v348_v50 }
 0x151   :  { %629 = vmatpush.msra.mxu2 %v332_v30  ;;  %649 = vmatpush.msra.mxu3 %v333_v52 }
 0x152   :  { %927 = vmatmul.msk.f32.vlgmr.msra.gmra.mxu2 %vm570_vm15, %v527_v51  ;;  %928 = vmatmul.msk.f32.vlgmr.msra.gmra.mxu3 %vm570_vm15, %v527_v51 }
 0x153   :  { %v1078_v57 = vpop.permute.xlu0 %1077 }
 0x154   :  { %v1080_v63 = vunpack.i.h.bf16 %v1078_v57  ;;  %v1079_v59 = vunpack.i.l.bf16 %v1078_v57 }
 0x156   :  { %v144_v4 = vsel %vm143_vm12, %v1015_v61, %v1079_v59  ;;  %v145_v2 = vsel %vm143_vm12, %v1079_v59, %v1080_v63 }
 0x157   :  { %587 = vmatpush.msra.mxu0 %v144_v4  ;;  %607 = vmatpush.msra.mxu1 %v145_v2 }
 0x159   :  { %588 = vmatpush.msra.mxu0 %v111_v6  ;;  %608 = vmatpush.msra.mxu1 %v112_v5 }
 0x15b   :  { %v93_v7 = vpop.permute.xlu0 %92  ;;  %589 = vmatpush.msra.mxu0 %v95_v36 }
 0x15c   :  { %925 = vmatmul.msk.f32.vlgmr.msra.gmra.mxu0 %vm570_vm15, %v527_v51  ;;  %v96_v17 = vsel %vm94_vm14, %v1085_v1, %v93_v7  ;;  %v804_v7 = vld [vmem:[#allocation8 + $0x178] sm:$0xff] }
 0x15d   :  { %609 = vmatpush.msra.mxu1 %v96_v17  ;;  %v803_v17 = vld [vmem:[#allocation8 + $0x170] sm:$0xff]  ;;  %866 = vmatpush.msrb.mxu2 %v804_v7  ;;  %v777_v7 = vld [vmem:[#allocation8 + $0xa0] sm:$0xff] }
 0x15e   :  { %926 = vmatmul.msk.f32.vlgmr.msra.gmra.mxu1 %vm570_vm15, %v527_v51 }
 0x15f   :  { %867 = vmatpush.msrb.mxu2 %v803_v17  ;;  %v805_v17 = vld [vmem:[#allocation8 + $0x180] sm:$0xff] }
 0x1d5   :  { %v631_v9 = vpop.f32.mrf.mxu2  ;;  %v651_v10 = vpop.f32.mrf.mxu3 }
 0x1d6   :  { %v1524_v49 = vadd.f32 %v631_v9, %v568_v8  ;;  %v652_v11 = vadd.f32 %v651_v10, %v568_v8  ;;  %v802_v9 = vld [vmem:[#allocation8 + $0x168] sm:$0xff]  ;;  %v817_v10 = vld [vmem:[#allocation8 + $0x1e0] sm:$0xff] }
 0x1d7   :  { %868 = vmatpush.msrb.mxu2 %v802_v9  ;;  %v760_v9 = vld [vmem:[#allocation8 + $0x18] sm:$0xff] }
 0x1d8   :  { %v656_v54 = vmin.f32 %v1524_v49, 20.0  ;;  %v657_v58 = vmin.f32 %v652_v11, 20.0  ;;  %vm697_vm0 = vcmp.gt.f32.partialorder %v652_v11, 20.0  ;;  %vm696_vm2 = vcmp.gt.f32.partialorder %v1524_v49, 20.0 }
 0x1d9   :  { %v591_v60 = vpop.f32.mrf.mxu0 }
 0x1da   :  { %v662_v43 = vmul.f32 1.442695, %v656_v54  ;;  %v664_v42 = vmul.f32 1.442695, %v657_v58  ;;  %v592_v47 = vadd.f32 %v591_v60, %v568_v8  ;;  %v788_v54 = vld [vmem:[#allocation8 + $0xf8] sm:$0xff]  ;;  %v771_v60 = vld [vmem:[#allocation8 + $0x70] sm:$0xff] }
 0x1db   :  { %v611_v12 = vpop.f32.mrf.mxu1  ;;  %v816_v58 = vld [vmem:[#allocation8 + $0x1d8] sm:$0xff]  ;;  %846 = vmatpush.msrb.mxu1 %v788_v54  ;;  %v775_v54 = vld [vmem:[#allocation8 + $0x90] sm:$0xff] }
 0x1dc   :  { %1098 = vpow2.f32 %v662_v43  ;;  %v654_v13 = vmin.f32 %v592_v47, 20.0  ;;  %v612_v40 = vadd.f32 %v611_v12, %v568_v8  ;;  %vm694_vm1 = vcmp.gt.f32.partialorder %v592_v47, 20.0  ;;  %v818_v8 = vld [vmem:[#allocation8 + $0x1e8] sm:$0x7f]  ;;  %v801_v43 = vld [vmem:[#allocation8 + $0x160] sm:$0xff] }
 0x1dd   :  { %1100 = vpow2.f32 %v664_v42  ;;  %929 = vmatpush.msk.msrb.mxu3 %vm822_vm4, %v818_v8  ;;  %v815_v42 = vld [vmem:[#allocation8 + $0x1d0] sm:$0xff]  ;;  %v786_v12 = vld [vmem:[#allocation8 + $0xe8] sm:$0xff]  ;;  %869 = vmatpush.msrb.mxu2 %v801_v43  ;;  %v789_v8 = vld [vmem:[#allocation8 + $0x100] sm:$0xff] }
 0x1de   :  { %v658_v41 = vmul.f32 1.442695, %v654_v13  ;;  %v655_v18 = vmin.f32 %v612_v40, 20.0  ;;  %vm695_vm3 = vcmp.gt.f32.partialorder %v612_v40, 20.0  ;;  %v800_v13 = vld [vmem:[#allocation8 + $0x158] sm:$0xff]  ;;  %v773_v43 = vld [vmem:[#allocation8 + $0x80] sm:$0xff] }
 0x1df   :  { %889 = vmatpush.msrb.mxu3 %v817_v10  ;;  %870 = vmatpush.msrb.mxu2 %v800_v13  ;;  %v776_v10 = vld [vmem:[#allocation8 + $0x98] sm:$0xff] }
 0x1e0   :  { %1102 = vpow2.f32 %v658_v41  ;;  %v660_v20 = vmul.f32 1.442695, %v655_v18  ;;  %v799_v41 = vld [vmem:[#allocation8 + $0x150] sm:$0xff]  ;;  %v798_v18 = vld [vmem:[#allocation8 + $0x148] sm:$0xff] }
 0x1e1   :  { %890 = vmatpush.msrb.mxu3 %v816_v58  ;;  %871 = vmatpush.msrb.mxu2 %v799_v41  ;;  %v758_v58 = vld [vmem:[#allocation8 + $0x8] sm:$0xff] }
 0x1e2   :  { %v1099_v21 = vpop.eup %1098  ;;  %1104 = vpow2.f32 %v660_v20 }
 0x1e3   :  { %v1101_v22 = vpop.eup %1100  ;;  %v668_v23 = vadd.f32 2.0, %v1099_v21  ;;  %891 = vmatpush.msrb.mxu3 %v815_v42  ;;  %872 = vmatpush.msrb.mxu2 %v798_v18 }
 0x1e4   :  { %v669_v24 = vadd.f32 2.0, %v1101_v22 }
 0x1e5   :  { %v672_v25 = vmul.f32 %v1099_v21, %v668_v23 }
 0x1e6   :  { %v1103_v26 = vpop.eup %1102  ;;  %v673_v28 = vmul.f32 %v1101_v22, %v669_v24 }
 0x1e7   :  { %v676_v15 = vadd.f32 2.0, %v672_v25  ;;  %v666_v29 = vadd.f32 2.0, %v1103_v26  ;;  %v700_v52 = vmul.f32 %v672_v25, %v1524_v49 }
 0x1e8   :  { %v1105_v46 = vpop.eup %1104  ;;  %v677_v14 = vadd.f32 2.0, %v673_v28  ;;  %v701_v30 = vmul.f32 %v673_v28, %v652_v11 }
 0x1e9   :  { %1106 = vrcp.f32 %v676_v15  ;;  %v670_v31 = vmul.f32 %v1103_v26, %v666_v29  ;;  %v667_v32 = vadd.f32 2.0, %v1105_v46 }
 0x1ea   :  { %1108 = vrcp.f32 %v677_v14 }
 0x1eb   :  { %v674_v33 = vadd.f32 2.0, %v670_v31  ;;  %v671_v16 = vmul.f32 %v1105_v46, %v667_v32  ;;  %v698_v57 = vmul.f32 %v670_v31, %v592_v47  ;;  %v769_v32 = vld [vmem:[#allocation8 + $0x60] sm:$0xff] }
 0x1ed   :  { %1110 = vrcp.f32 %v674_v33  ;;  %v675_v27 = vadd.f32 2.0, %v671_v16  ;;  %v699_v1 = vmul.f32 %v671_v16, %v612_v40  ;;  %v813_v16 = vld [vmem:[#allocation8 + $0x1c0] sm:$0xff] }
 0x1ef   :  { %v1107_v34 = vpop.eup %1106  ;;  %1112 = vrcp.f32 %v675_v27 }
 0x1f0   :  { %v1109_v35 = vpop.eup %1108  ;;  %v684_v38 = vmul.f32 %v1107_v34, %v676_v15 }
 0x1f1   :  { %v685_v37 = vmul.f32 %v1109_v35, %v677_v14 }
 0x1f2   :  { %v688_v19 = vsub.f32 2.0, %v684_v38  ;;  %v812_v38 = vld [vmem:[#allocation8 + $0x1b8] sm:$0xff] }
 0x1f3   :  { %v1111_v39 = vpop.eup %1110  ;;  %v689_v44 = vsub.f32 2.0, %v685_v37  ;;  %v796_v37 = vld [vmem:[#allocation8 + $0x138] sm:$0xff] }
 0x1f4   :  { %v682_v45 = vmul.f32 %v1111_v39, %v674_v33  ;;  %v692_v48 = vmul.f32 %v1107_v34, %v688_v19  ;;  %v785_v33 = vld [vmem:[#allocation8 + $0xe0] sm:$0xff]  ;;  %v768_v34 = vld [vmem:[#allocation8 + $0x58] sm:$0xff]  ;;  %v767_v19 = vld [vmem:[#allocation8 + $0x50] sm:$0xff] }
 0x1f5   :  { %v1113_v50 = vpop.eup %1112  ;;  %v693_v51 = vmul.f32 %v1109_v35, %v689_v44  ;;  %v784_v35 = vld [vmem:[#allocation8 + $0xd8] sm:$0xff]  ;;  %v811_v44 = vld [vmem:[#allocation8 + $0x1b0] sm:$0xff] }
 0x1f6   :  { %v683_v53 = vmul.f32 %v1113_v50, %v675_v27  ;;  %v686_v55 = vsub.f32 2.0, %v682_v45  ;;  %v704_v63 = vmul.f32 %v700_v52, %v692_v48  ;;  %v797_v27 = vld [vmem:[#allocation8 + $0x140] sm:$0xff]  ;;  %v795_v45 = vld [vmem:[#allocation8 + $0x130] sm:$0xff]  ;;  %v766_v48 = vld [vmem:[#allocation8 + $0x48] sm:$0xff] }
 0x1f7   :  { %v705_v56 = vmul.f32 %v701_v30, %v693_v51  ;;  %873 = vmatpush.msrb.mxu2 %v797_v27  ;;  %v810_v51 = vld [vmem:[#allocation8 + $0x1a8] sm:$0xff]  ;;  %v765_v52 = vld [vmem:[#allocation8 + $0x40] sm:$0xff] }
 0x1f8   :  { %v687_v61 = vsub.f32 2.0, %v683_v53  ;;  %v690_v62 = vmul.f32 %v1111_v39, %v686_v55  ;;  %v708_v5 = vsel %vm696_vm2, %v1524_v49, %v704_v63  ;;  %v787_v49 = vld [vmem:[#allocation8 + $0xf0] sm:$0xff]  ;;  %v794_v30 = vld [vmem:[#allocation8 + $0x128] sm:$0xff]  ;;  %v781_v53 = vld [vmem:[#allocation8 + $0xc0] sm:$0xff] }
 0x1f9   :  { %v709_v59 = vsel %vm697_vm0, %v652_v11, %v705_v56  ;;  %v772_v11 = vld [vmem:[#allocation8 + $0x78] sm:$0xff]  ;;  %847 = vmatpush.msrb.mxu1 %v787_v49  ;;  %v783_v39 = vld [vmem:[#allocation8 + $0xd0] sm:$0xff]  ;;  %874 = vmatpush.msrb.mxu2 %v796_v37  ;;  %v809_v55 = vld [vmem:[#allocation8 + $0x1a0] sm:$0xff] }
 0x1fa   :  { %720 = vrot.lane.b32.xlu0 %v709_v59, %s1239_s1  ;;  %v691_v0 = vmul.f32 %v1113_v50, %v687_v61  ;;  %v702_v3 = vmul.f32 %v698_v57, %v690_v62  ;;  %826 = vmatpush.msrb.mxu0 %v772_v11  ;;  %v782_v50 = vld [vmem:[#allocation8 + $0xc8] sm:$0xff]  ;;  %v793_v56 = vld [vmem:[#allocation8 + $0x120] sm:$0xff]  ;;  %v764_v57 = vld [vmem:[#allocation8 + $0x38] sm:$0xff] }
 0x1fb   :  { %848 = vmatpush.msrb.mxu1 %v786_v12  ;;  %875 = vmatpush.msrb.mxu2 %v795_v45  ;;  %v780_v61 = vld [vmem:[#allocation8 + $0xb8] sm:$0xff]  ;;  %v759_v11 = vld [vmem:[#allocation8 + $0x10] sm:$0xff]  ;;  %v757_v49 = vld [vmem:[#allocation8] sm:$0xff] }
 0x1fc   :  { %v703_v4 = vmul.f32 %v699_v1, %v691_v0  ;;  %v706_v2 = vsel %vm694_vm1, %v592_v47, %v702_v3  ;;  %v770_v47 = vld [vmem:[#allocation8 + $0x68] sm:$0xff]  ;;  %827 = vmatpush.msrb.mxu0 %v771_v60  ;;  %v808_v62 = vld [vmem:[#allocation8 + $0x198] sm:$0xff]  ;;  %v779_v0 = vld [vmem:[#allocation8 + $0xb0] sm:$0xff] }
 0x1fd   :  { %v1087_v6 = vpack.i.bf16 %v706_v2, %v708_v5  ;;  %849 = vmatpush.msrb.mxu1 %v785_v33  ;;  %876 = vmatpush.msrb.mxu2 %v794_v30  ;;  %v792_v63 = vld [vmem:[#allocation8 + $0x118] sm:$0xff]  ;;  %v807_v1 = vld [vmem:[#allocation8 + $0x190] sm:$0xff]  ;;  %v774_v60 = vld [vmem:[#allocation8 + $0x88] sm:$0xff] }
 0x1fe   :  { %v707_v36 = vsel %vm695_vm3, %v612_v40, %v703_v4  ;;  %v814_v40 = vld [vmem:[#allocation8 + $0x1c8] sm:$0xff]  ;;  %828 = vmatpush.msrb.mxu0 %v770_v47  ;;  %v791_v3 = vld [vmem:[#allocation8 + $0x110] sm:$0xff] }
 0x1ff   :  { %716 = vrot.lane.b32.xlu1 %v707_v36, %s1239_s1  ;;  %1088 = vrot.lane.b32.xlu2 %v1087_v6, %s1239_s1  ;;  %v806_v4 = vld [vmem:[#allocation8 + $0x188] sm:$0xff] }
 0x200   :  { %892 = vmatpush.msrb.mxu3 %v814_v40  ;;  %829 = vmatpush.msrb.mxu0 %v769_v32  ;;  %v790_v6 = vld [vmem:[#allocation8 + $0x108] sm:$0xff] }
 0x201   :  { %850 = vmatpush.msrb.mxu1 %v784_v35  ;;  %877 = vmatpush.msrb.mxu2 %v793_v56 }
 0x202   :  { %893 = vmatpush.msrb.mxu3 %v813_v16  ;;  %830 = vmatpush.msrb.mxu0 %v768_v34 }
 0x203   :  { %851 = vmatpush.msrb.mxu1 %v783_v39  ;;  %878 = vmatpush.msrb.mxu2 %v792_v63 }
 0x204   :  { %894 = vmatpush.msrb.mxu3 %v812_v38  ;;  %831 = vmatpush.msrb.mxu0 %v767_v19 }
 0x205   :  { %852 = vmatpush.msrb.mxu1 %v782_v50  ;;  %879 = vmatpush.msrb.mxu2 %v791_v3 }
 0x206   :  { %895 = vmatpush.msrb.mxu3 %v811_v44  ;;  %832 = vmatpush.msrb.mxu0 %v766_v48 }
 0x207   :  { %853 = vmatpush.msrb.mxu1 %v781_v53  ;;  %880 = vmatpush.msrb.mxu2 %v790_v6 }
 0x208   :  { %896 = vmatpush.msrb.mxu3 %v810_v51  ;;  %833 = vmatpush.msrb.mxu0 %v765_v52 }
 0x209   :  { %854 = vmatpush.msrb.mxu1 %v780_v61  ;;  %881 = vmatpush.msrb.mxu2 %v789_v8 }
 0x20a   :  { %897 = vmatpush.msrb.mxu3 %v809_v55  ;;  %834 = vmatpush.msrb.mxu0 %v764_v57 }
 0x20b   :  { %855 = vmatpush.msrb.mxu1 %v779_v0 }
 0x20c   :  { %898 = vmatpush.msrb.mxu3 %v808_v62 }
 0x20e   :  { %899 = vmatpush.msrb.mxu3 %v807_v1 }
 0x210   :  { %900 = vmatpush.msrb.mxu3 %v806_v4 }
 0x212   :  { %901 = vmatpush.msrb.mxu3 %v805_v17 }
 0x259   :  { %v1089_v20 = vpop.permute.xlu2 %1088 }
 0x25a   :  { %v1090_v23 = vunpack.i.l.bf16 %v1089_v20  ;;  %v1091_v24 = vunpack.i.h.bf16 %v1089_v20 }
 0x26c   :  { %v721_v21 = vpop.permute.xlu0 %720 }
 0x26d   :  { %v1530_v22 = vmax.f32 %v709_v59, %v721_v21  ;;  %v725_v25 = vsel %vm722_vm5, %v1090_v23, %v721_v21  ;;  %v763_v59 = vld [vmem:[#allocation8 + $0x30] sm:$0xff] }
 0x26e   :  { %v1534_v29 = vmax.f32 %v708_v5, %v725_v25  ;;  %835 = vmatpush.msrb.mxu0 %v763_v59  ;;  %v778_v5 = vld [vmem:[#allocation8 + $0xa8] sm:$0xff] }
 0x26f   :  { %744 = vrot.lane.b32.xlu0 %v1530_v22, %s1231_s17  ;;  %856 = vmatpush.msrb.mxu1 %v778_v5 }
 0x271   :  { %v717_v26 = vpop.permute.xlu1 %716  ;;  %857 = vmatpush.msrb.mxu1 %v777_v7 }
 0x272   :  { %v723_v28 = vsel %vm722_vm5, %v1091_v24, %v717_v26  ;;  %v724_v15 = vsel %vm722_vm5, %v717_v26, %v1090_v23 }
 0x273   :  { %v1536_v46 = vmax.f32 %v706_v2, %v723_v28  ;;  %v1538_v14 = vmax.f32 %v707_v36, %v724_v15  ;;  %v762_v2 = vld [vmem:[#allocation8 + $0x28] sm:$0xff]  ;;  %v761_v36 = vld [vmem:[#allocation8 + $0x20] sm:$0xff]  ;;  %858 = vmatpush.msrb.mxu1 %v776_v10 }
 0x274   :  { %836 = vmatpush.msrb.mxu0 %v762_v2 }
 0x275   :  { %740 = vrot.lane.b32.xlu1 %v1538_v14, %s1231_s17  ;;  %v1092_v31 = vpack.i.bf16 %v1536_v46, %v1534_v29  ;;  %859 = vmatpush.msrb.mxu1 %v775_v54 }
 0x276   :  { %837 = vmatpush.msrb.mxu0 %v761_v36 }
 0x277   :  { %1093 = vrot.lane.b32.xlu2 %v1092_v31, %s1231_s17  ;;  %860 = vmatpush.msrb.mxu1 %v774_v60 }
 0x278   :  { %838 = vmatpush.msrb.mxu0 %v760_v9 }
 0x279   :  { %861 = vmatpush.msrb.mxu1 %v773_v43 }
 0x27a   :  { %839 = vmatpush.msrb.mxu0 %v759_v11 }
 0x27c   :  { %840 = vmatpush.msrb.mxu0 %v758_v58 }
 0x27e   :  { %841 = vmatpush.msrb.mxu0 %v757_v49 }
 0x2d1   :  { %v1094_v42 = vpop.permute.xlu2 %1093 }
 0x2d2   :  { %v1095_v47 = vunpack.i.l.bf16 %v1094_v42  ;;  %v1096_v18 = vunpack.i.h.bf16 %v1094_v42 }
 0x2e1   :  { %v745_v12 = vpop.permute.xlu0 %744 }
 0x2e2   :  { %v748_v13 = vsel %vm110_vm13, %v1095_v47, %v745_v12  ;;  %v756_v40 = vmax.f32 %v1530_v22, %v745_v12 }
 0x2e3   :  { %v755_v41 = vmax.f32 %v1534_v29, %v748_v13 }
 0x2e4   :  { %930 = vmatmul.msk.f32.vlgmr.msrb.gmra.mxu3 %vm143_vm12, %v756_v40 }
 0x2e5   :  { %882 = vmatmul.f32.vlgmr.msrb.gmra.mxu2 %v755_v41 }
 0x2e7   :  { %v741_v20 = vpop.permute.xlu1 %740 }
 0x2e8   :  { %v746_v21 = vsel %vm110_vm13, %v1096_v18, %v741_v20  ;;  %v747_v23 = vsel %vm110_vm13, %v741_v20, %v1095_v47 }
 0x2e9   :  { %v753_v24 = vmax.f32 %v1536_v46, %v746_v21  ;;  %v754_v25 = vmax.f32 %v1538_v14, %v747_v23 }
 0x2eb   :  { %842 = vmatmul.f32.vlgmr.msrb.gmra.mxu0 %v753_v24  ;;  %862 = vmatmul.f32.vlgmr.msrb.gmra.mxu1 %v754_v25 }
 0x367   :  { %v903_v31 = vpop.f32.mrf.mxu3 }
 0x368   :  { %v843_v26 = vpop.f32.mrf.mxu0  ;;  %v863_v28 = vpop.f32.mrf.mxu1 }
 0x369   :  { %v864_v22 = vadd.f32 %v863_v28, %v843_v26  ;;  %v883_v15 = vpop.f32.mrf.mxu2 }
 0x36b   :  { %v884_v29 = vadd.f32 %v883_v15, %v864_v22 }
 0x36d   :  { %v904_v32 = vadd.f32 %v903_v31, %v884_v29 }
 0x36f   :  { %906 = vst [vmem:[#allocation9] sm:$0xff] %v904_v32 }
 0x370   :  { %917 = dma.vmem_to_hbm [thread:$0]  %s913_s28, 128, %s915_s6, [#allocation5]  }
 0x371   :  { %1214 = dma.done.wait [#allocation5], 128  }
 0x372   :  { %1215 = vsyncadd [#allocation5], 4294967168 }
 0x373   :  { %922 = vsyncpa [#allocation4], 1 }
 0x374   :  { %923 = vsyncpa [#allocation7], 1 }
 0x375   :  { %924 = vsyncpa [#allocation5], 1 }

</bundles_post_ra>
